<compile_context>
chip_gen: v7x
topology: tpu7x:2x2x1
jax: 0.10.0
libtpu: 0.0.40
codegen_flags: <defaults>
</compile_context>

<pallas_src>
import jax
import jax.numpy as jnp
from jax import lax
from jax.experimental import pallas as pl
from jax.experimental.pallas import tpu as pltpu

# ----------------------------- config ---------------------------------------
B_HALF = 10          # forward() hardcodes q = q_k[:10], k = q_k[10:]
PAD_HALF = 16        # each half padded to 16 rows -> sublane-aligned slices
B_PACK = 2 * PAD_HALF
C, T_FR, H_SP, W_SP = 4, 2, 8, 8
FEAT = C * T_FR * H_SP * W_SP          # 512
HIDDEN = 256
DIM = 128
TEMP = 0.07


# ----------------------------- kernel ---------------------------------------
def _moco_encoder_kernel(xq_ref, xk_ref, w1_ref, w2_ref, b_ref,
                         q_ref, k_ref, loss_ref, xbuf_ref):
    # ---- pack both halves into one 16-row-aligned (32, FEAT) f32 block ------
    xbuf_ref[...] = jnp.zeros_like(xbuf_ref)          # zero pad rows
    xbuf_ref[0:B_HALF, :] = xq_ref[...]                # rows  0..9
    xbuf_ref[PAD_HALF:PAD_HALF + B_HALF, :] = xk_ref[...]   # rows 16..25

    x = xbuf_ref[...].astype(jnp.bfloat16)             # (32, FEAT) bf16
    w1 = w1_ref[...]                                    # (FEAT, HIDDEN) bf16
    w2 = w2_ref[...]                                    # (HIDDEN, DIM) bf16
    b1 = b_ref[0:1, :]                                  # (1, HIDDEN) f32
    b2 = b_ref[1:2, 0:DIM]                              # (1, DIM)    f32

    # ---- one fused encoder chain: bf16 MXU matmuls, f32 epilogue ------------
    h = jnp.dot(x, w1, preferred_element_type=jnp.float32) + b1
    h = jnp.maximum(h, 0.0)
    e = jnp.dot(h.astype(jnp.bfloat16), w2,
                preferred_element_type=jnp.float32) + b2
    inv_norm = lax.rsqrt(jnp.sum(e * e, axis=-1, keepdims=True) + 1e-12)
    e = e * inv_norm                                    # (32, DIM) f32, L2-normed

    e_q = e[0:B_HALF, :]                                # (10, DIM)
    e_k = e[PAD_HALF:PAD_HALF + B_HALF, :]              # (10, DIM)

    q_ref[...] = e_q.astype(q_ref.dtype)
    k_ref[...] = e_k.astype(k_ref.dtype)

    # ---- ITC loss: symmetric InfoNCE with diagonal targets ------------------
    inv_t = jnp.float32(1.0 / TEMP)
    contract = (((1,), (1,)), ((), ()))                 # contract both lane dims
    logits = lax.dot_general(e_q.astype(jnp.bfloat16), e_k.astype(jnp.bfloat16),
                             contract,
                             preferred_element_type=jnp.float32) * inv_t  # (10,10)

    # q -> k direction: logsumexp along the lane axis.
    m_r = jnp.max(logits, axis=-1, keepdims=True)
    lse_r = m_r + jnp.log(jnp.sum(jnp.exp(logits - m_r), axis=-1, keepdims=True))

    # k -> q direction: logits_kq == logits_qk.T, so reduce along the sublane
    # axis (XLU) instead of issuing a second MXU sequence.
    m_c = jnp.max(logits, axis=0, keepdims=True)
    lse_c = m_c + jnp.log(jnp.sum(jnp.exp(logits - m_c), axis=0, keepdims=True))

    # Positive (diagonal) logits, shared by both directions (f32 operands).
    pos = jnp.sum(e_q * e_k, axis=-1, keepdims=True) * inv_t   # (10, 1)

    loss_ref[0, 0] = 0.5 * (jnp.mean(lse_r) + jnp.mean(lse_c)) - jnp.mean(pos)


# ----------------------------- wrapper ---------------------------------------
def _init_params(key):
    """Kernel-ready parameters, prepared ONCE (outside the per-call forward):
    bf16 weights (halves the dominant weight DMA) and both biases packed into
    a single (2, HIDDEN) f32 array: row 0 = b1, row 1 = [b2, 0...]."""
    k1, k2, k3, k4 = jax.random.split(key, 4)
    w1 = jax.random.normal(k1, (FEAT, HIDDEN), jnp.float32) / jnp.sqrt(FEAT)
    b1 = jax.random.normal(k2, (HIDDEN,), jnp.float32) * 0.01
    w2 = jax.random.normal(k3, (HIDDEN, DIM), jnp.float32) / jnp.sqrt(HIDDEN)
    b2 = jax.random.normal(k4, (DIM,), jnp.float32) * 0.01

    b_packed = jnp.zeros((2, HIDDEN), jnp.float32)
    b_packed = b_packed.at[0, :].set(b1)
    b_packed = b_packed.at[1, :DIM].set(b2)
    return w1.astype(jnp.bfloat16), w2.astype(jnp.bfloat16), b_packed


def moco_mtv_forward(vd_q, vd_k, params):
    """vd_q, vd_k: [B_HALF, C, T, H, W] float32 (NCTHW)."""
    w1b, w2b, b_packed = params

    # Flatten each half (row-major == torch .view); no host concat, no astype.
    xq = vd_q.reshape(B_HALF, -1)
    xk = vd_k.reshape(B_HALF, -1)

    vmem = pl.BlockSpec(memory_space=pltpu.MemorySpace.VMEM)
    smem = pl.BlockSpec(memory_space=pltpu.MemorySpace.SMEM)

    cost = pl.CostEstimate(
        flops=2 * B_PACK * (FEAT * HIDDEN + HIDDEN * DIM)
              + 2 * B_HALF * B_HALF * DIM,
        transcendentals=2 * B_HALF * B_HALF + 2 * B_HALF + B_PACK,
        bytes_accessed=(2 * B_HALF * FEAT * 4                      # f32 inputs
                        + (FEAT * HIDDEN + HIDDEN * DIM) * 2       # bf16 weights
                        + 2 * HIDDEN * 4                           # packed bias
                        + 2 * B_HALF * DIM * 4 + 4),               # outputs + loss
    )

    q, k, itc = pl.pallas_call(
        _moco_encoder_kernel,
        out_shape=(
            jax.ShapeDtypeStruct((B_HALF, DIM), jnp.float32),
            jax.ShapeDtypeStruct((B_HALF, DIM), jnp.float32),
            jax.ShapeDtypeStruct((1, 1), jnp.float32),
        ),
        in_specs=[vmem, vmem, vmem, vmem, vmem],
        out_specs=(vmem, vmem, smem),
        scratch_shapes=[pltpu.VMEM((B_PACK, FEAT), jnp.float32)],
        cost_estimate=cost,
    )(xq, xk, w1b, w2b, b_packed)

    return q, k, itc[0, 0]


# ----------------------------- main ------------------------------------------
if __name__ == "__main__":
    root = jax.random.PRNGKey(0)
    kq, kk, kp = jax.random.split(root, 3)

    vd_q = jax.random.normal(kq, (B_HALF, C, T_FR, H_SP, W_SP), jnp.float32)
    vd_k = jax.random.normal(kk, (B_HALF, C, T_FR, H_SP, W_SP), jnp.float32)
    params = _init_params(kp)   # prepared once, outside the jitted forward

    q, k, itc_loss = jax.jit(moco_mtv_forward)(vd_q, vd_k, params)
    jax.block_until_ready((q, k, itc_loss))

    assert q.shape == (B_HALF, DIM)
    assert k.shape == (B_HALF, DIM)
    assert itc_loss.shape == ()
    print("KERNEL_OK")
</pallas_src>

<mosaic_0001>
module attributes {stable_mosaic.version = 11 : i64} {
  func.func @_moco_encoder_kernel(%arg0: memref<10x512xf32, #tpu.memory_space<vmem>>, %arg1: memref<10x512xf32, #tpu.memory_space<vmem>>, %arg2: memref<512x256xbf16, #tpu.memory_space<vmem>>, %arg3: memref<256x128xbf16, #tpu.memory_space<vmem>>, %arg4: memref<2x256xf32, #tpu.memory_space<vmem>>, %arg5: memref<10x128xf32, #tpu.memory_space<vmem>>, %arg6: memref<10x128xf32, #tpu.memory_space<vmem>>, %arg7: memref<1x1xf32, #tpu.memory_space<smem>>, %arg8: memref<32x512xf32, #tpu.memory_space<vmem>>) attributes {dimension_semantics = [], scalar_prefetch = 0 : i64, scratch_operands = 1 : i64, tpu.core_type = #tpu.core_type<tc>} {
    %cst = arith.constant 0.000000e+00 : f32
    %0 = vector.broadcast %cst : f32 to vector<32x512xf32>
    %c0 = arith.constant 0 : index
    %c0_0 = arith.constant 0 : index
    %1 = vector.load %arg8[%c0, %c0_0] : memref<32x512xf32, #tpu.memory_space<vmem>>, vector<32x512xf32>
    tpu.vector_store %arg8[%c0, %c0_0], %0 {strides = array<i32>} : memref<32x512xf32, #tpu.memory_space<vmem>>, vector<32x512xf32>,
    %c0_1 = arith.constant 0 : index
    %c0_2 = arith.constant 0 : index
    %2 = vector.load %arg0[%c0_1, %c0_2] : memref<10x512xf32, #tpu.memory_space<vmem>>, vector<10x512xf32>
    %c0_3 = arith.constant 0 : index
    %c0_4 = arith.constant 0 : index
    %3 = vector.load %arg8[%c0_3, %c0_4] : memref<32x512xf32, #tpu.memory_space<vmem>>, vector<10x512xf32>
    tpu.vector_store %arg8[%c0_3, %c0_4], %2 {strides = array<i32>} : memref<32x512xf32, #tpu.memory_space<vmem>>, vector<10x512xf32>,
    %c0_5 = arith.constant 0 : index
    %c0_6 = arith.constant 0 : index
    %4 = vector.load %arg1[%c0_5, %c0_6] : memref<10x512xf32, #tpu.memory_space<vmem>>, vector<10x512xf32>
    %c16 = arith.constant 16 : index
    %c0_7 = arith.constant 0 : index
    %5 = vector.load %arg8[%c16, %c0_7] : memref<32x512xf32, #tpu.memory_space<vmem>>, vector<10x512xf32>
    tpu.vector_store %arg8[%c16, %c0_7], %4 {strides = array<i32>} : memref<32x512xf32, #tpu.memory_space<vmem>>, vector<10x512xf32>,
    %c0_8 = arith.constant 0 : index
    %c0_9 = arith.constant 0 : index
    %6 = vector.load %arg8[%c0_8, %c0_9] : memref<32x512xf32, #tpu.memory_space<vmem>>, vector<32x512xf32>
    %7 = arith.truncf %6 : vector<32x512xf32> to vector<32x512xbf16>
    %c0_10 = arith.constant 0 : index
    %c0_11 = arith.constant 0 : index
    %8 = vector.load %arg2[%c0_10, %c0_11] : memref<512x256xbf16, #tpu.memory_space<vmem>>, vector<512x256xbf16>
    %c0_12 = arith.constant 0 : index
    %c0_13 = arith.constant 0 : index
    %9 = vector.load %arg3[%c0_12, %c0_13] : memref<256x128xbf16, #tpu.memory_space<vmem>>, vector<256x128xbf16>
    %c0_14 = arith.constant 0 : index
    %c0_15 = arith.constant 0 : index
    %10 = vector.load %arg4[%c0_14, %c0_15] : memref<2x256xf32, #tpu.memory_space<vmem>>, vector<1x256xf32>
    %c1 = arith.constant 1 : index
    %c0_16 = arith.constant 0 : index
    %11 = vector.load %arg4[%c1, %c0_16] : memref<2x256xf32, #tpu.memory_space<vmem>>, vector<1x128xf32>
    %cst_17 = arith.constant dense<0.000000e+00> : vector<32x256xf32>
    %12 = tpu.matmul %7, %8, %cst_17 {dimension_numbers = #tpu.dot_dimension_numbers<[1], [0], [0], [1], [0, 0, 1, 1], [], []>} : vector<32x512xbf16>, vector<512x256xbf16>, vector<32x256xf32> -> vector<32x256xf32>
    %13 = vector.broadcast %10 : vector<1x256xf32> to vector<32x256xf32>
    %14 = arith.addf %12, %13 : vector<32x256xf32>
    %cst_18 = arith.constant 0.000000e+00 : f32
    %15 = vector.broadcast %cst_18 : f32 to vector<32x256xf32>
    %16 = arith.maximumf %14, %15 : vector<32x256xf32>
    %17 = arith.truncf %16 : vector<32x256xf32> to vector<32x256xbf16>
    %cst_19 = arith.constant dense<0.000000e+00> : vector<32x128xf32>
    %18 = tpu.matmul %17, %9, %cst_19 {dimension_numbers = #tpu.dot_dimension_numbers<[1], [0], [0], [1], [0, 0, 1, 1], [], []>} : vector<32x256xbf16>, vector<256x128xbf16>, vector<32x128xf32> -> vector<32x128xf32>
    %19 = vector.broadcast %11 : vector<1x128xf32> to vector<32x128xf32>
    %20 = arith.addf %18, %19 : vector<32x128xf32>
    %21 = arith.mulf %20, %20 : vector<32x128xf32>
    %cst_20 = arith.constant dense<0.000000e+00> : vector<32xf32>
    %22 = vector.multi_reduction <add>, %21, %cst_20 [1] : vector<32x128xf32> to vector<32xf32>
    %23 = vector.shape_cast %22 : vector<32xf32> to vector<32x1xf32>
    %cst_21 = arith.constant 9.99999996E-13 : f32
    %24 = vector.broadcast %cst_21 : f32 to vector<32x1xf32>
    %25 = arith.addf %23, %24 : vector<32x1xf32>
    %26 = math.rsqrt %25 : vector<32x1xf32>
    %27 = vector.broadcast %26 : vector<32x1xf32> to vector<32x128xf32>
    %28 = arith.mulf %20, %27 : vector<32x128xf32>
    %29 = vector.extract_strided_slice %28 {offsets = [0, 0], sizes = [10, 128], strides = [1, 1]} : vector<32x128xf32> to vector<10x128xf32>
    %30 = vector.extract_strided_slice %28 {offsets = [16, 0], sizes = [10, 128], strides = [1, 1]} : vector<32x128xf32> to vector<10x128xf32>
    %c0_22 = arith.constant 0 : index
    %c0_23 = arith.constant 0 : index
    %31 = vector.load %arg5[%c0_22, %c0_23] : memref<10x128xf32, #tpu.memory_space<vmem>>, vector<10x128xf32>
    tpu.vector_store %arg5[%c0_22, %c0_23], %29 {strides = array<i32>} : memref<10x128xf32, #tpu.memory_space<vmem>>, vector<10x128xf32>,
    %c0_24 = arith.constant 0 : index
    %c0_25 = arith.constant 0 : index
    %32 = vector.load %arg6[%c0_24, %c0_25] : memref<10x128xf32, #tpu.memory_space<vmem>>, vector<10x128xf32>
    tpu.vector_store %arg6[%c0_24, %c0_25], %30 {strides = array<i32>} : memref<10x128xf32, #tpu.memory_space<vmem>>, vector<10x128xf32>,
    %33 = arith.truncf %29 : vector<10x128xf32> to vector<10x128xbf16>
    %34 = arith.truncf %30 : vector<10x128xf32> to vector<10x128xbf16>
    %cst_26 = arith.constant dense<0.000000e+00> : vector<10x10xf32>
    %35 = tpu.matmul %33, %34, %cst_26 {dimension_numbers = #tpu.dot_dimension_numbers<[1], [1], [0], [0], [0, 0, 1, 0], [], []>} : vector<10x128xbf16>, vector<10x128xbf16>, vector<10x10xf32> -> vector<10x10xf32>
    %cst_27 = arith.constant 14.2857141 : f32
    %36 = vector.broadcast %cst_27 : f32 to vector<10x10xf32>
    %37 = arith.mulf %35, %36 : vector<10x10xf32>
    %cst_28 = arith.constant dense<0xFF800000> : vector<10xf32>
    %38 = vector.multi_reduction <maximumf>, %37, %cst_28 [1] : vector<10x10xf32> to vector<10xf32>
    %39 = vector.shape_cast %38 : vector<10xf32> to vector<10x1xf32>
    %40 = vector.broadcast %39 : vector<10x1xf32> to vector<10x10xf32>
    %41 = arith.subf %37, %40 : vector<10x10xf32>
    %42 = math.exp %41 : vector<10x10xf32>
    %cst_29 = arith.constant dense<0.000000e+00> : vector<10xf32>
    %43 = vector.multi_reduction <add>, %42, %cst_29 [1] : vector<10x10xf32> to vector<10xf32>
    %44 = vector.shape_cast %43 : vector<10xf32> to vector<10x1xf32>
    %45 = math.log %44 : vector<10x1xf32>
    %46 = arith.addf %39, %45 : vector<10x1xf32>
    %cst_30 = arith.constant dense<0xFF800000> : vector<10xf32>
    %47 = vector.multi_reduction <maximumf>, %37, %cst_30 [0] : vector<10x10xf32> to vector<10xf32>
    %48 = vector.shape_cast %47 : vector<10xf32> to vector<1x10xf32>
    %49 = vector.broadcast %48 : vector<1x10xf32> to vector<10x10xf32>
    %50 = arith.subf %37, %49 : vector<10x10xf32>
    %51 = math.exp %50 : vector<10x10xf32>
    %cst_31 = arith.constant dense<0.000000e+00> : vector<10xf32>
    %52 = vector.multi_reduction <add>, %51, %cst_31 [0] : vector<10x10xf32> to vector<10xf32>
    %53 = vector.shape_cast %52 : vector<10xf32> to vector<1x10xf32>
    %54 = math.log %53 : vector<1x10xf32>
    %55 = arith.addf %48, %54 : vector<1x10xf32>
    %56 = arith.mulf %29, %30 : vector<10x128xf32>
    %cst_32 = arith.constant dense<0.000000e+00> : vector<10xf32>
    %57 = vector.multi_reduction <add>, %56, %cst_32 [1] : vector<10x128xf32> to vector<10xf32>
    %58 = vector.shape_cast %57 : vector<10xf32> to vector<10x1xf32>
    %cst_33 = arith.constant 14.2857141 : f32
    %59 = vector.broadcast %cst_33 : f32 to vector<10x1xf32>
    %60 = arith.mulf %58, %59 : vector<10x1xf32>
    %61 = vector.shape_cast %46 : vector<10x1xf32> to vector<1x10x1xf32>
    %cst_34 = arith.constant dense<0.000000e+00> : vector<1xf32>
    %62 = vector.multi_reduction <add>, %61, %cst_34 [1, 2] : vector<1x10x1xf32> to vector<1xf32>
    %63 = vector.shape_cast %62 : vector<1xf32> to vector<1x1x1xf32>
    %64 = vector.extract %63[0, 0, 0] : f32 from vector<1x1x1xf32>
    %cst_35 = arith.constant 1.000000e+01 : f32
    %65 = arith.divf %64, %cst_35 : f32
    %66 = vector.shape_cast %55 : vector<1x10xf32> to vector<1x1x10xf32>
    %cst_36 = arith.constant dense<0.000000e+00> : vector<1xf32>
    %67 = vector.multi_reduction <add>, %66, %cst_36 [1, 2] : vector<1x1x10xf32> to vector<1xf32>
    %68 = vector.shape_cast %67 : vector<1xf32> to vector<1x1x1xf32>
    %69 = vector.extract %68[0, 0, 0] : f32 from vector<1x1x1xf32>
    %cst_37 = arith.constant 1.000000e+01 : f32
    %70 = arith.divf %69, %cst_37 : f32
    %71 = arith.addf %65, %70 : f32
    %cst_38 = arith.constant 5.000000e-01 : f32
    %72 = arith.mulf %cst_38, %71 : f32
    %73 = vector.shape_cast %60 : vector<10x1xf32> to vector<1x10x1xf32>
    %cst_39 = arith.constant dense<0.000000e+00> : vector<1xf32>
    %74 = vector.multi_reduction <add>, %73, %cst_39 [1, 2] : vector<1x10x1xf32> to vector<1xf32>
    %75 = vector.shape_cast %74 : vector<1xf32> to vector<1x1x1xf32>
    %76 = vector.extract %75[0, 0, 0] : f32 from vector<1x1x1xf32>
    %cst_40 = arith.constant 1.000000e+01 : f32
    %77 = arith.divf %76, %cst_40 : f32
    %78 = arith.subf %72, %77 : f32
    %c0_41 = arith.constant 0 : index
    %c0_42 = arith.constant 0 : index
    %79 = memref.load %arg7[%c0_41, %c0_42] : memref<1x1xf32, #tpu.memory_space<smem>>
    memref.store %78, %arg7[%c0_41, %c0_42] : memref<1x1xf32, #tpu.memory_space<smem>>
    return
  }
}

</mosaic_0001>

<bundles_post_ra>
// kernel: moco_mtv_forward.1
= control target key start
LH: loop header
LB: loop body
LE: loop exit
PB: predicated region body
PF: predicated region fallthrough
CT: control target
= control target key end

     0   :  { %13 = vsyncpa [#allocation4], 0  ;;  %s1773_s0 = inlined_call_operand.vmem [shape: f32[10,512], index: 0, kind: input, shape index: {}]   ;;  %s1774_s1 = inlined_call_operand.vmem [shape: f32[10,512], index: 1, kind: input, shape index: {}]   ;;  %s1775_s2 = inlined_call_operand.vmem [shape: bf16[512,256], index: 2, kind: input, shape index: {}]   ;;  %s1776_s3 = inlined_call_operand.vmem [shape: bf16[256,128], index: 3, kind: input, shape index: {}]   ;;  %s1777_s4 = inlined_call_operand.vmem [shape: f32[2,256], index: 4, kind: input, shape index: {}]   ;;  %s1778_s5 = inlined_call_operand.hbm [shape: f32[10,128], index: 5, kind: output, shape index: {0}]   ;;  %s1779_s6 = inlined_call_operand.hbm [shape: f32[10,128], index: 6, kind: output, shape index: {1}]   ;;  %s1780_s7 = inlined_call_operand.hbm [shape: f32[1,1], index: 7, kind: output, shape index: {2}]  }
   0x1   :  { %14 = vsyncpa [#allocation7], 0  ;;  %v1171_v0 = vld [vmem:[%s1775_s2 + $0x4] ss:$8 sps:$4 sm:$0xff]   ;;  %v1365_v2 = vmov 0.0   ;;  %v46_v53 = vld [vmem:[%s1773_s0 + $0x18] sm:$0xff] }
   0x2   :  { %v1173_v1 = vld [vmem:[%s1775_s2 + $0x104] ss:$8 sps:$4 sm:$0xff]   ;;  %32 = vst [vmem:[#allocation2 + $0x28] sm:$0xff] %v1365_v2  ;;  %31 = vst [vmem:[#allocation2 + $0x20] sm:$0xff] %v1365_v2  ;;  %528 = vmatprep.subr.bf16.mxu1 %v1171_v0  ;;  %v1175_v3 = vld [vmem:[%s1775_s2] ss:$8 sps:$4 sm:$0xff]  }
   0x3   :  { %33 = vst [vmem:[#allocation2 + $0x30] sm:$0xff] %v1365_v2  ;;  %34 = vst [vmem:[#allocation2 + $0x38] sm:$0xff] %v1365_v2  ;;  %v1176_v4 = vld [vmem:[%s1775_s2 + $0x100] ss:$8 sps:$4 sm:$0xff]   ;;  %581 = vmatprep.subr.bf16.mxu0 %v1173_v1  ;;  %v1177_v5 = vld [vmem:[%s1775_s2 + $0x14] ss:$8 sps:$4 sm:$0xff]   ;;  %529 = vmatpush1.bf16.msra.mxu1 %v1175_v3 }
   0x4   :  { %39 = vst [vmem:[#allocation2 + $0x60] sm:$0xff] %v1365_v2  ;;  %40 = vst [vmem:[#allocation2 + $0x68] sm:$0xff] %v1365_v2  ;;  %582 = vmatpush1.bf16.msra.mxu0 %v1176_v4  ;;  %v1179_v6 = vld [vmem:[%s1775_s2 + $0x114] ss:$8 sps:$4 sm:$0xff]   ;;  %v1181_v7 = vld [vmem:[%s1775_s2 + $0x10] ss:$8 sps:$4 sm:$0xff]   ;;  %530 = vmatprep.subr.bf16.mxu1 %v1177_v5 }
   0x5   :  { %41 = vst [vmem:[#allocation2 + $0x70] sm:$0xff] %v1365_v2  ;;  %42 = vst [vmem:[#allocation2 + $0x78] sm:$0xff] %v1365_v2  ;;  %v1182_v8 = vld [vmem:[%s1775_s2 + $0x110] ss:$8 sps:$4 sm:$0xff]   ;;  %583 = vmatprep.subr.bf16.mxu0 %v1179_v6  ;;  %v1183_v9 = vld [vmem:[%s1775_s2 + $0x24] ss:$8 sps:$4 sm:$0xff]  }
   0x6   :  { %v1185_v10 = vld [vmem:[%s1775_s2 + $0x124] ss:$8 sps:$4 sm:$0xff]   ;;  %v1187_v11 = vld [vmem:[%s1775_s2 + $0x20] ss:$8 sps:$4 sm:$0xff]   ;;  %v1189_v13 = vld [vmem:[%s1775_s2 + $0x34] ss:$8 sps:$4 sm:$0xff]  }
   0x7   :  { %v1188_v12 = vld [vmem:[%s1775_s2 + $0x120] ss:$8 sps:$4 sm:$0xff]   ;;  %531 = vmatpush1.bf16.msra.mxu1 %v1181_v7  ;;  %v1191_v14 = vld [vmem:[%s1775_s2 + $0x134] ss:$8 sps:$4 sm:$0xff]   ;;  %v1193_v15 = vld [vmem:[%s1775_s2 + $0x30] ss:$8 sps:$4 sm:$0xff]  }
   0x8   :  { %584 = vmatpush1.bf16.msra.mxu0 %v1182_v8  ;;  %532 = vmatprep.subr.bf16.mxu1 %v1183_v9  ;;  %v1194_v16 = vld [vmem:[%s1775_s2 + $0x130] ss:$8 sps:$4 sm:$0xff]   ;;  %v1195_v17 = vld [vmem:[%s1775_s2 + $0x44] ss:$8 sps:$4 sm:$0xff]   ;;  %v1199_v19 = vld [vmem:[%s1775_s2 + $0x40] ss:$8 sps:$4 sm:$0xff]  }
   0x9   :  { %585 = vmatprep.subr.bf16.mxu0 %v1185_v10  ;;  %v1197_v18 = vld [vmem:[%s1775_s2 + $0x144] ss:$8 sps:$4 sm:$0xff]   ;;  %v1200_v20 = vld [vmem:[%s1775_s2 + $0x140] ss:$8 sps:$4 sm:$0xff]   ;;  %v1201_v21 = vld [vmem:[%s1775_s2 + $0x54] ss:$8 sps:$4 sm:$0xff]  }
   0xa   :  { %v1203_v22 = vld [vmem:[%s1775_s2 + $0x154] ss:$8 sps:$4 sm:$0xff]   ;;  %v1205_v23 = vld [vmem:[%s1775_s2 + $0x50] ss:$8 sps:$4 sm:$0xff]   ;;  %v1207_v25 = vld [vmem:[%s1775_s2 + $0x64] ss:$8 sps:$4 sm:$0xff]  }
   0xb   :  { %533 = vmatpush1.bf16.msra.mxu1 %v1187_v11  ;;  %v1206_v24 = vld [vmem:[%s1775_s2 + $0x150] ss:$8 sps:$4 sm:$0xff]   ;;  %v1209_v26 = vld [vmem:[%s1775_s2 + $0x164] ss:$8 sps:$4 sm:$0xff]   ;;  %v1211_v27 = vld [vmem:[%s1775_s2 + $0x60] ss:$8 sps:$4 sm:$0xff]  }
   0xc   :  { %586 = vmatpush1.bf16.msra.mxu0 %v1188_v12  ;;  %534 = vmatprep.subr.bf16.mxu1 %v1189_v13  ;;  %v1212_v28 = vld [vmem:[%s1775_s2 + $0x160] ss:$8 sps:$4 sm:$0xff]   ;;  %v1213_v29 = vld [vmem:[%s1775_s2 + $0x74] ss:$8 sps:$4 sm:$0xff]   ;;  %v1217_v31 = vld [vmem:[%s1775_s2 + $0x70] ss:$8 sps:$4 sm:$0xff]  }
   0xd   :  { %587 = vmatprep.subr.bf16.mxu0 %v1191_v14  ;;  %v1215_v30 = vld [vmem:[%s1775_s2 + $0x174] ss:$8 sps:$4 sm:$0xff]   ;;  %v1218_v32 = vld [vmem:[%s1775_s2 + $0x170] ss:$8 sps:$4 sm:$0xff]   ;;  %v1219_v33 = vld [vmem:[%s1775_s2 + $0x84] ss:$8 sps:$4 sm:$0xff]  }
   0xe   :  { %v1221_v34 = vld [vmem:[%s1775_s2 + $0x184] ss:$8 sps:$4 sm:$0xff]   ;;  %v1223_v35 = vld [vmem:[%s1775_s2 + $0x80] ss:$8 sps:$4 sm:$0xff]   ;;  %v1225_v37 = vld [vmem:[%s1775_s2 + $0x94] ss:$8 sps:$4 sm:$0xff]  }
   0xf   :  { %535 = vmatpush1.bf16.msra.mxu1 %v1193_v15  ;;  %v1224_v36 = vld [vmem:[%s1775_s2 + $0x180] ss:$8 sps:$4 sm:$0xff]   ;;  %v1227_v38 = vld [vmem:[%s1775_s2 + $0x194] ss:$8 sps:$4 sm:$0xff]   ;;  %v1229_v39 = vld [vmem:[%s1775_s2 + $0x90] ss:$8 sps:$4 sm:$0xff]  }
  0x10   :  { %588 = vmatpush1.bf16.msra.mxu0 %v1194_v16  ;;  %536 = vmatprep.subr.bf16.mxu1 %v1195_v17  ;;  %v1230_v40 = vld [vmem:[%s1775_s2 + $0x190] ss:$8 sps:$4 sm:$0xff]   ;;  %v1231_v41 = vld [vmem:[%s1775_s2 + $0xa4] ss:$8 sps:$4 sm:$0xff]   ;;  %v1235_v43 = vld [vmem:[%s1775_s2 + $0xa0] ss:$8 sps:$4 sm:$0xff]  }
  0x11   :  { %589 = vmatprep.subr.bf16.mxu0 %v1197_v18  ;;  %v1233_v42 = vld [vmem:[%s1775_s2 + $0x1a4] ss:$8 sps:$4 sm:$0xff]   ;;  %v1236_v44 = vld [vmem:[%s1775_s2 + $0x1a0] ss:$8 sps:$4 sm:$0xff]   ;;  %v1237_v45 = vld [vmem:[%s1775_s2 + $0xb4] ss:$8 sps:$4 sm:$0xff]  }
  0x12   :  { %v1239_v46 = vld [vmem:[%s1775_s2 + $0x1b4] ss:$8 sps:$4 sm:$0xff]   ;;  %v1241_v47 = vld [vmem:[%s1775_s2 + $0xb0] ss:$8 sps:$4 sm:$0xff]   ;;  %v44_v49 = vld [vmem:[%s1773_s0 + $0x8] sm:$0xff] }
  0x13   :  { %537 = vmatpush1.bf16.msra.mxu1 %v1199_v19  ;;  %v1242_v48 = vld [vmem:[%s1775_s2 + $0x1b0] ss:$8 sps:$4 sm:$0xff]   ;;  %v1243_v50 = vld [vmem:[%s1775_s2 + $0xc4] ss:$8 sps:$4 sm:$0xff]   ;;  %v48_v52 = vld [vmem:[%s1773_s0 + $0x28] sm:$0x3] }
  0x14   :  { %590 = vmatpush1.bf16.msra.mxu0 %v1200_v20  ;;  %538 = vmatprep.subr.bf16.mxu1 %v1201_v21  ;;  %v1245_v51 = vld [vmem:[%s1775_s2 + $0x1c4] ss:$8 sps:$4 sm:$0xff]   ;;  %v50_v54 = vld [vmem:[%s1773_s0 + $0x38] sm:$0x3]  ;;  %56 = vst [vmem:[#allocation2 + $0x28] sm:$0x3] %v48_v52 }
  0x15   :  { %591 = vmatprep.subr.bf16.mxu0 %v1203_v22  ;;  %58 = vst [vmem:[#allocation2 + $0x38] sm:$0x3] %v50_v54  ;;  %v1585_v55 = vld [vmem:[%s1773_s0] sm:$0xff]  ;;  %v1593_v57 = vld [vmem:[%s1773_s0 + $0x10] sm:$0xff]  ;;  %v1601_v59 = vld [vmem:[%s1774_s1 + $0x8] sm:$0xff] }
  0x16   :  { %v47_v56 = vld [vmem:[%s1773_s0 + $0x20] sm:$0x3]  ;;  %v49_v58 = vld [vmem:[%s1773_s0 + $0x30] sm:$0x3]  ;;  %v64_v60 = vld [vmem:[%s1774_s1 + $0x28] sm:$0x3] }
  0x17   :  { %539 = vmatpush1.bf16.msra.mxu1 %v1205_v23  ;;  %55 = vst [vmem:[#allocation2 + $0x20] sm:$0x3] %v47_v56  ;;  %v1247_v61 = vld [vmem:[%s1775_s2 + $0xc0] ss:$8 sps:$4 sm:$0xff]   ;;  %57 = vst [vmem:[#allocation2 + $0x30] sm:$0x3] %v49_v58 }
  0x18   :  { %592 = vmatpush1.bf16.msra.mxu0 %v1206_v24  ;;  %540 = vmatprep.subr.bf16.mxu1 %v1207_v25  ;;  %v1248_v62 = vld [vmem:[%s1775_s2 + $0x1c0] ss:$8 sps:$4 sm:$0xff]   ;;  %72 = vst [vmem:[#allocation2 + $0x68] sm:$0x3] %v64_v60  ;;  %v62_v63 = vld [vmem:[%s1774_s1 + $0x18] sm:$0xff]  ;;  %v1629_v4 = vld [vmem:[%s1774_s1 + $0x10] sm:$0xff] }
  0x19   :  { %593 = vmatprep.subr.bf16.mxu0 %v1209_v26  ;;  %v66_v0 = vld [vmem:[%s1774_s1 + $0x38] sm:$0x3]  ;;  %v1621_v1 = vld [vmem:[%s1774_s1] sm:$0xff]  ;;  %v65_v5 = vld [vmem:[%s1774_s1 + $0x30] sm:$0x3] }
  0x1a   :  { %74 = vst [vmem:[#allocation2 + $0x78] sm:$0x3] %v66_v0  ;;  %v63_v3 = vld [vmem:[%s1774_s1 + $0x20] sm:$0x3]  ;;  %v1249_v6 = vld [vmem:[%s1775_s2 + $0xd4] ss:$8 sps:$4 sm:$0xff]  }
  0x1b   :  { %541 = vmatpush1.bf16.msra.mxu1 %v1211_v27  ;;  %71 = vst [vmem:[#allocation2 + $0x60] sm:$0x3] %v63_v3  ;;  %73 = vst [vmem:[#allocation2 + $0x70] sm:$0x3] %v65_v5  ;;  %v1251_v7 = vld [vmem:[%s1775_s2 + $0x1d4] ss:$8 sps:$4 sm:$0xff]  }
  0x1c   :  { %594 = vmatpush1.bf16.msra.mxu0 %v1212_v28  ;;  %542 = vmatprep.subr.bf16.mxu1 %v1213_v29  ;;  %v80_v8 = vld [vmem:[#allocation2 + $0x28] sm:$0xff]  ;;  %v82_v9 = vld [vmem:[#allocation2 + $0x38] sm:$0xff]  ;;  %v1267_v24 = vld [vmem:[%s1776_s3 + $0x40] sm:$0xff]  }
  0x1d   :  { %595 = vmatprep.subr.bf16.mxu0 %v1215_v30  ;;  %v1253_v10 = vld [vmem:[%s1775_s2 + $0xd0] ss:$8 sps:$4 sm:$0xff]   ;;  %v92_v12 = vpack.c.bf16 %v80_v8, %v44_v49  ;;  %v94_v13 = vpack.c.bf16 %v82_v9, %v46_v53  ;;  %v1255_v14 = vld [vmem:[%s1775_s2 + $0xe4] ss:$8 sps:$4 sm:$0xff]   ;;  %v1259_v16 = vld [vmem:[%s1775_s2 + $0xe0] ss:$8 sps:$4 sm:$0xff]  }
  0x1e   :  { %v1254_v11 = vld [vmem:[%s1775_s2 + $0x1d0] ss:$8 sps:$4 sm:$0xff]   ;;  %v1257_v15 = vld [vmem:[%s1775_s2 + $0x1e4] ss:$8 sps:$4 sm:$0xff]   ;;  %v1260_v17 = vld [vmem:[%s1775_s2 + $0x1e0] ss:$8 sps:$4 sm:$0xff]  }
  0x1f   :  { %543 = vmatpush1.bf16.msra.mxu1 %v1217_v31  ;;  %560 = vmatprep.mubr.bf16.mxu1 %v92_v12  ;;  %v1261_v18 = vld [vmem:[%s1775_s2 + $0xf4] ss:$8 sps:$4 sm:$0xff]   ;;  %v1265_v20 = vld [vmem:[%s1775_s2 + $0xf0] ss:$8 sps:$4 sm:$0xff]   ;;  %v79_v22 = vld [vmem:[#allocation2 + $0x20] sm:$0xff] }
  0x20   :  { %596 = vmatpush1.bf16.msra.mxu0 %v1218_v32  ;;  %544 = vmatprep.subr.bf16.mxu1 %v1219_v33  ;;  %v1263_v19 = vld [vmem:[%s1775_s2 + $0x1f4] ss:$8 sps:$4 sm:$0xff]   ;;  %v1266_v21 = vld [vmem:[%s1775_s2 + $0x1f0] ss:$8 sps:$4 sm:$0xff]   ;;  %v88_v25 = vld [vmem:[#allocation2 + $0x68] sm:$0xff]  ;;  %v91_v27 = vpack.c.bf16 %v79_v22, %v1585_v55 }
  0x21   :  { %597 = vmatprep.subr.bf16.mxu0 %v1221_v34  ;;  %613 = vmatprep.mubr.bf16.mxu0 %v94_v13  ;;  %v81_v23 = vld [vmem:[#allocation2 + $0x30] sm:$0xff]  ;;  %v90_v26 = vld [vmem:[#allocation2 + $0x78] sm:$0xff]  ;;  %v96_v29 = vpack.c.bf16 %v88_v25, %v1601_v59  ;;  %v1268_v31 = vld [vmem:[%s1776_s3] sm:$0xff]  }
  0x22   :  { %v93_v28 = vpack.c.bf16 %v81_v23, %v1593_v57  ;;  %v98_v30 = vpack.c.bf16 %v90_v26, %v62_v63 }
  0x23   :  { %545 = vmatpush1.bf16.msra.mxu1 %v1223_v35 }
  0x24   :  { %598 = vmatpush1.bf16.msra.mxu0 %v1224_v36  ;;  %546 = vmatprep.subr.bf16.mxu1 %v1225_v37 }
  0x25   :  { %599 = vmatprep.subr.bf16.mxu0 %v1227_v38 }
  0x27   :  { %547 = vmatpush1.bf16.msra.mxu1 %v1229_v39 }
  0x28   :  { %600 = vmatpush1.bf16.msra.mxu0 %v1230_v40  ;;  %548 = vmatprep.subr.bf16.mxu1 %v1231_v41 }
  0x29   :  { %601 = vmatprep.subr.bf16.mxu0 %v1233_v42 }
  0x2b   :  { %549 = vmatpush1.bf16.msra.mxu1 %v1235_v43 }
  0x2c   :  { %602 = vmatpush1.bf16.msra.mxu0 %v1236_v44  ;;  %550 = vmatprep.subr.bf16.mxu1 %v1237_v45 }
  0x2d   :  { %603 = vmatprep.subr.bf16.mxu0 %v1239_v46 }
  0x2f   :  { %551 = vmatpush1.bf16.msra.mxu1 %v1241_v47 }
  0x30   :  { %604 = vmatpush1.bf16.msra.mxu0 %v1242_v48  ;;  %552 = vmatprep.subr.bf16.mxu1 %v1243_v50 }
  0x31   :  { %605 = vmatprep.subr.bf16.mxu0 %v1245_v51 }
  0x33   :  { %553 = vmatpush1.bf16.msra.mxu1 %v1247_v61 }
  0x34   :  { %606 = vmatpush1.bf16.msra.mxu0 %v1248_v62  ;;  %554 = vmatprep.subr.bf16.mxu1 %v1249_v6 }
  0x35   :  { %607 = vmatprep.subr.bf16.mxu0 %v1251_v7 }
  0x37   :  { %555 = vmatpush1.bf16.msra.mxu1 %v1253_v10 }
  0x38   :  { %608 = vmatpush1.bf16.msra.mxu0 %v1254_v11  ;;  %556 = vmatprep.subr.bf16.mxu1 %v1255_v14 }
  0x39   :  { %609 = vmatprep.subr.bf16.mxu0 %v1257_v15 }
  0x3b   :  { %557 = vmatpush1.bf16.msra.mxu1 %v1259_v16 }
  0x3c   :  { %610 = vmatpush1.bf16.msra.mxu0 %v1260_v17  ;;  %558 = vmatprep.subr.bf16.mxu1 %v1261_v18 }
  0x3d   :  { %611 = vmatprep.subr.bf16.mxu0 %v1263_v19 }
  0x3f   :  { %559 = vmatpush1.bf16.msra.mxu1 %v1265_v20 }
  0x40   :  { %612 = vmatpush1.bf16.msra.mxu0 %v1266_v21  ;;  %1136 = vmatprep.subr.bf16.mxu1 %v1365_v2 }
  0x41   :  { %1106 = vmatprep.subr.bf16.mxu0 %v1267_v24 }
  0x42   :  { %15 = vsyncpa [#allocation5], 0  ;;  %v1269_v32 = vld [vmem:[%s1776_s3 + $0x48] sm:$0xff]   ;;  %561 = vmatmul.mubr.bf16.vlgmr.msra.gmra.mrb[0].mxu1 %v91_v27  ;;  %v87_v33 = vld [vmem:[#allocation2 + $0x60] sm:$0xff]  ;;  %v198_v50 = vlaneseq  ;;  %vm1366_vm0 = vmmov 0   ;;  %vm868_vm1 = vcmask 80896  }
  0x43   :  { %614 = vmatmul.mubr.bf16.vlgmr.msra.gmra.mrb[0].mxu0 %v93_v28  ;;  %570 = vmatprep.mubr.bf16.mxu1 %v96_v29  ;;  %v89_v34 = vld [vmem:[#allocation2 + $0x70] sm:$0xff]  ;;  %v1270_v35 = vld [vmem:[%s1776_s3 + $0x8] sm:$0xff]   ;;  %v95_v37 = vpack.c.bf16 %v87_v33, %v1621_v1  ;;  %v1273_v40 = vld [vmem:[%s1776_s3 + $0x58] sm:$0xff]   ;;  %vm872_vm2 = vcmask 74752   ;;  %vm923_vm3 = vcmask 1041408   ;;  %vm946_vm4 = vcmask 73728  }
  0x44   :  { %623 = vmatprep.mubr.bf16.mxu0 %v98_v30  ;;  %1107 = vmatpush3.bf16.msra.mxu0 %v1268_v31  ;;  %v1271_v36 = vld [vmem:[%s1776_s3 + $0x50] sm:$0xff]   ;;  %v97_v38 = vpack.c.bf16 %v89_v34, %v1629_v4  ;;  %v1274_v41 = vld [vmem:[%s1776_s3 + $0x18] sm:$0xff]   ;;  %v1275_v42 = vld [vmem:[%s1776_s3 + $0x60] sm:$0xff]   ;;  %v199_v51 = vshrl.u32 %v198_v50, 7  ;;  %vm929_vm5 = vcmask 7168   ;;  %vm931_vm6 = vcmask 1024  }
  0x45   :  { %1108 = vmatprep.subr.bf16.mxu0 %v1269_v32  ;;  %v1272_v39 = vld [vmem:[%s1776_s3 + $0x10] sm:$0xff]   ;;  %v1276_v43 = vld [vmem:[%s1776_s3 + $0x20] sm:$0xff]   ;;  %v1277_v44 = vld [vmem:[%s1776_s3 + $0x68] sm:$0xff]  }
  0x46   :  { %v1278_v45 = vld [vmem:[%s1776_s3 + $0x28] sm:$0xff]   ;;  %v1279_v46 = vld [vmem:[%s1776_s3 + $0x70] sm:$0xff]   ;;  %v1281_v48 = vld [vmem:[%s1776_s3 + $0x78] sm:$0xff]   ;;  %v200_v52 = vsub.s32 0, %v199_v51  ;;  %v204_v54 = vsub.s32 1, %v199_v51 }
  0x47   :  { %v1280_v47 = vld [vmem:[%s1776_s3 + $0x30] sm:$0xff]   ;;  %v1282_v49 = vld [vmem:[%s1776_s3 + $0x38] sm:$0xff]   ;;  %v195_v53 = vld [vmem:[%s1777_s4] ss:$2 sm:$0x3] }
  0x48   :  { %1109 = vmatpush3.bf16.msra.mxu0 %v1270_v35  ;;  %v201_v55 = vrot.slane %v195_v53, %v200_v52  ;;  %v205_v56 = vrot.slane %v195_v53, %v204_v54 }
  0x49   :  { %1110 = vmatprep.subr.bf16.mxu0 %v1271_v36 }
  0x4a   :  { %571 = vmatmul.mubr.bf16.gmra.mrb[4].mxu1 %v95_v37 }
  0x4b   :  { %624 = vmatmul.mubr.bf16.gmra.mrb[4].mxu0 %v97_v38  ;;  %1138 = vmatprep.mubr.msk.bf16.mxu1 %vm1366_vm0, %v1365_v2 }
  0x4c   :  { %1111 = vmatpush3.bf16.msra.mxu0 %v1272_v39 }
  0x4d   :  { %1112 = vmatprep.subr.bf16.mxu0 %v1273_v40  ;;  %v1089_v40 = vld [vmem:[%s1777_s4 + $0x1] ss:$0 sm:$0xff]  ;;  %s1367_s4 = smov [#allocation3]  }
  0x4e   :  { %s985_s27 = sshll.u32 %s1367_s4, 4  ;;  %s986_s27 = int_to_ptr.vmem [resolvable:$true] %s985_s27 }
  0x4f   :  { %s1305_s28 = scalar_lea.vmem %s986_s27, 256  ;;  %p1310_p1 = scmp.lt.s32.totalorder %s986_s27, %s986_s27 }
  0x50   :  { %1113 = vmatpush3.bf16.msra.mxu0 %v1274_v41  ;;  %p1306_p0 = scmp.ne.s32.totalorder %s986_s27, %s1305_s28  ;;  %p1311_p2 = scmp.lt.s32.totalorder %s1305_s28, %s1305_s28 }
  0x51   :  { %1114 = vmatprep.subr.bf16.mxu0 %v1275_v42 }
  0x52   :  { %p1312_p3 = por %p1311_p2, %p1310_p1 }
  0x54   :  { %1115 = vmatpush3.bf16.msra.mxu0 %v1276_v43  ;;  %p1313_p4 = pnand %p1312_p3, %p1306_p0 }
  0x55   :  { %1116 = vmatprep.subr.bf16.mxu0 %v1277_v44 }
  0x58   :  { %1117 = vmatpush3.bf16.msra.mxu0 %v1278_v45 }
  0x59   :  { %1118 = vmatprep.subr.bf16.mxu0 %v1279_v46 }
  0x5c   :  { %1119 = vmatpush3.bf16.msra.mxu0 %v1280_v47 }
  0x5d   :  { %1120 = vmatprep.subr.bf16.mxu0 %v1281_v48 }
  0x60   :  { %1121 = vmatpush3.bf16.msra.mxu0 %v1282_v49 }
 0x115   :  { %v562_v57 = vpop.f32.mrb[0].mxu1 }
 0x116   :  { %v615_v58 = vpop.f32.mrb[0].mxu0  ;;  %v563_v59 = vadd.f32 %v562_v57, %v201_v55  ;;  %v564_v60 = vpop.f32.mrb[1].mxu1 }
 0x117   :  { %v617_v61 = vpop.f32.mrb[1].mxu0  ;;  %v565_v62 = vadd.f32 %v564_v60, %v205_v56  ;;  %v566_v63 = vpop.f32.mrb[2].mxu1 }
 0x118   :  { %v619_v0 = vpop.f32.mrb[2].mxu0  ;;  %v616_v1 = vadd.f32 %v615_v58, %v563_v59  ;;  %v567_v3 = vadd.f32 %v566_v63, %v201_v55  ;;  %v568_v4 = vpop.f32.mrb[3].mxu1 }
 0x119   :  { %v621_v5 = vpop.f32.mrb[3].mxu0  ;;  %v618_v6 = vadd.f32 %v617_v61, %v565_v62  ;;  %v569_v7 = vadd.f32 %v568_v4, %v205_v56 }
 0x11a   :  { %v620_v8 = vadd.f32 %v619_v0, %v567_v3  ;;  %v634_v10 = vmax.f32 %v616_v1, 0.0 }
 0x11b   :  { %v622_v9 = vadd.f32 %v621_v5, %v569_v7  ;;  %v635_v12 = vmax.f32 %v618_v6, 0.0 }
 0x11c   :  { %v636_v11 = vmax.f32 %v620_v8, 0.0 }
 0x11d   :  { %v637_v13 = vmax.f32 %v622_v9, 0.0  ;;  %v572_v14 = vpop.f32.mrb[4].mxu1 }
 0x11e   :  { %v625_v15 = vpop.f32.mrb[4].mxu0  ;;  %v642_v16 = vpack.c.bf16 %v636_v11, %v634_v10  ;;  %v573_v17 = vadd.f32 %v572_v14, %v201_v55  ;;  %v574_v18 = vpop.f32.mrb[5].mxu1 }
 0x11f   :  { %v627_v19 = vpop.f32.mrb[5].mxu0  ;;  %v643_v20 = vpack.c.bf16 %v637_v13, %v635_v12  ;;  %v575_v21 = vadd.f32 %v574_v18, %v205_v56  ;;  %v576_v22 = vpop.f32.mrb[6].mxu1 }
 0x120   :  { %v629_v23 = vpop.f32.mrb[6].mxu0  ;;  %v626_v24 = vadd.f32 %v625_v15, %v573_v17  ;;  %v577_v25 = vadd.f32 %v576_v22, %v201_v55  ;;  %v578_v26 = vpop.f32.mrb[7].mxu1 }
 0x121   :  { %v631_v27 = vpop.f32.mrb[7].mxu0  ;;  %v628_v28 = vadd.f32 %v627_v19, %v575_v21  ;;  %v579_v29 = vadd.f32 %v578_v26, %v205_v56  ;;  %778 = vmatprep.mubr.bf16.mxu0 %v643_v20 }
 0x122   :  { %v630_v30 = vadd.f32 %v629_v23, %v577_v25  ;;  %779 = vmatmul.mubr.bf16.vlgmr.msra.gmra.mrb[8].mxu0 %v642_v16  ;;  %v638_v32 = vmax.f32 %v626_v24, 0.0 }
 0x123   :  { %v632_v31 = vadd.f32 %v631_v27, %v579_v29  ;;  %v639_v34 = vmax.f32 %v628_v28, 0.0 }
 0x124   :  { %v640_v33 = vmax.f32 %v630_v30, 0.0 }
 0x125   :  { %v641_v35 = vmax.f32 %v632_v31, 0.0 }
 0x126   :  { %v644_v36 = vpack.c.bf16 %v640_v33, %v638_v32 }
 0x127   :  { %v645_v37 = vpack.c.bf16 %v641_v35, %v639_v34 }
 0x129   :  { %786 = vmatprep.mubr.bf16.mxu0 %v645_v37 }
 0x12a   :  { %787 = vmatmul.mubr.bf16.gmra.mrb[12].mxu0 %v644_v36 }
 0x1f5   :  { %v1122_v38 = vpop.f32.mrb[8].mxu0 }
 0x1f6   :  { %v1123_v39 = vpop.f32.mrb[9].mxu0 }
 0x1f7   :  { %v1124_v41 = vadd.f32 %v1123_v39, %v1122_v38  ;;  %v1125_v42 = vpop.f32.mrb[10].mxu0 }
 0x1f8   :  { %v1126_v43 = vpop.f32.mrb[11].mxu0 }
 0x1f9   :  { %v1127_v44 = vadd.f32 %v1126_v43, %v1125_v42  ;;  %v781_v45 = vadd.f32 %v1124_v41, %v1089_v40 }
 0x1fb   :  { %v784_v46 = vadd.f32 %v1127_v44, %v1089_v40  ;;  %v795_v47 = vmul.f32 %v781_v45, %v781_v45 }
 0x1fd   :  { %v1128_v48 = vpop.f32.mrb[12].mxu0  ;;  %799 = vadd.xlane.f32.xlu1 %v795_v47  ;;  %v796_v52 = vmul.f32 %v784_v46, %v784_v46 }
 0x1fe   :  { %v1129_v49 = vpop.f32.mrb[13].mxu0 }
 0x1ff   :  { %v1130_v50 = vadd.f32 %v1129_v49, %v1128_v48  ;;  %v1131_v51 = vpop.f32.mrb[14].mxu0 }
 0x200   :  { %v1132_v53 = vpop.f32.mrb[15].mxu0 }
 0x201   :  { %v1133_v54 = vadd.f32 %v1132_v53, %v1131_v51  ;;  %801 = vadd.xlane.f32.xlu1 %v796_v52  ;;  %v789_v55 = vadd.f32 %v1130_v50, %v1089_v40 }
 0x203   :  { %v792_v56 = vadd.f32 %v1133_v54, %v1089_v40  ;;  %v797_v57 = vmul.f32 %v789_v55, %v789_v55 }
 0x205   :  { %803 = vadd.xlane.f32.xlu0 %v797_v57  ;;  %v798_v58 = vmul.f32 %v792_v56, %v792_v56 }
 0x209   :  { %805 = vadd.xlane.f32.xlu0 %v798_v58 }
 0x28a   :  { %v800_v59 = vpop.xlane.xlu1 %799 }
 0x28b   :  { %v807_v60 = vadd.f32 1e-12, %v800_v59 }
 0x28d   :  { %1283 = vrsqrt.f32 %v807_v60 }
 0x28e   :  { %v802_v61 = vpop.xlane.xlu1 %801 }
 0x28f   :  { %v808_v62 = vadd.f32 1e-12, %v802_v61 }
 0x291   :  { %1285 = vrsqrt.f32 %v808_v62 }
 0x292   :  { %v804_v63 = vpop.xlane.xlu0 %803 }
 0x293   :  { %v809_v0 = vadd.f32 1e-12, %v804_v63 }
 0x295   :  { %1287 = vrsqrt.f32 %v809_v0 }
 0x296   :  { %v806_v1 = vpop.xlane.xlu0 %805 }
 0x297   :  { %v1284_v3 = vpop.eup %1283  ;;  %v810_v4 = vadd.f32 1e-12, %v806_v1 }
 0x298   :  { %v815_v5 = vmul.f32 %v1284_v3, %v781_v45 }
 0x299   :  { %1289 = vrsqrt.f32 %v810_v4 }
 0x29a   :  { %819 = vst [vmem:[#allocation3] sm:$0xff] %v815_v5 }
 0x29b   :  { %v1286_v6 = vpop.eup %1285 }
 0x29c   :  { %v816_v7 = vmul.f32 %v1286_v6, %v784_v46 }
 0x29e   :  { %820 = vst [vmem:[#allocation3 + $0x8] sm:$0x3] %v816_v7  ;;  %v823_v14 = vpack.c.bf16 %v816_v7, %v815_v5 }
 0x29f   :  { %v1288_v8 = vpop.eup %1287 }
 0x2a0   :  { %v817_v2 = vmul.f32 %v1288_v8, %v789_v55 }
 0x2a2   :  { %821 = vst [vmem:[#allocation6] sm:$0xff] %v817_v2  ;;  %v919_v9 = vmul.f32 %v817_v2, %v815_v5 }
 0x2a3   :  { %v1290_v10 = vpop.eup %1289 }
 0x2a4   :  { %v818_v11 = vmul.f32 %v1290_v10, %v792_v56 }
 0x2a6   :  { %v824_v12 = vpack.c.bf16 %v818_v11, %v817_v2  ;;  %822 = vst [vmem:[#allocation6 + $0x8] sm:$0x3] %v818_v11  ;;  %v920_v13 = vmul.f32 %v818_v11, %v816_v7 }
 0x2a8   :  { %1137 = vmatpush3.bf16.xpose.msra.mxu1 %v824_v12  ;;  %v924_v57 = vsel %vm923_vm3, %v920_v13, 0.0 }
 0x2af   :  { %1139 = vmatmul.mubr.bf16.vlgmr.msra.gmra.mrb[8].mxu1 %v823_v14 }
 0x382   :  { %v859_v15 = vpop.f32.mrb[8].mxu1 }
 0x383   :  { %v866_v16 = vmul.f32 14.285714, %v859_v15  ;;  %v1140_v17 = vpop.f32.mrb[9].mxu1 }
 0x384   :  { %v862_v18 = vpop.f32.mrb[10].mxu1 }
 0x385   :  { %v867_v19 = vmul.f32 14.285714, %v862_v18  ;;  %v1141_v20 = vpop.f32.mrb[11].mxu1  ;;  %v869_v21 = vsel %vm868_vm1, %v866_v16, -inf }
 0x386   :  { %870 = vmax.xlane.f32.xlu0 %v869_v21 }
 0x387   :  { %v873_v22 = vsel %vm872_vm2, %v867_v19, -inf }
 0x388   :  { %874 = vmax.xlane.f32.xlu1 %v873_v22  ;;  %v894_v23 = vmax.f32 %v869_v21, %v873_v22 }
 0x38a   :  { %v895_v24 = vrot.slane %v894_v23, 4 }
 0x38c   :  { %v896_v25 = vmax.f32 %v894_v23, %v895_v24 }
 0x38e   :  { %v897_v26 = vrot.slane %v896_v25, 2 }
 0x390   :  { %v898_v27 = vmax.f32 %v896_v25, %v897_v26 }
 0x392   :  { %v899_v28 = vrot.slane %v898_v27, 1 }
 0x394   :  { %v900_v29 = vmax.f32 %v898_v27, %v899_v28 }
 0x396   :  { %v901_v30 = vsub.f32 %v866_v16, %v900_v29  ;;  %v902_v31 = vsub.f32 %v867_v19, %v900_v29 }
 0x398   :  { %v903_v32 = vmul.f32 1.442695, %v901_v30  ;;  %v905_v33 = vmul.f32 1.442695, %v902_v31 }
 0x39a   :  { %1291 = vpow2.f32 %v903_v32 }
 0x39b   :  { %1293 = vpow2.f32 %v905_v33 }
 0x3a4   :  { %v1292_v34 = vpop.eup %1291 }
 0x3a5   :  { %v1294_v35 = vpop.eup %1293  ;;  %v907_v36 = vsel %vm868_vm1, %v1292_v34, 0.0 }
 0x3a6   :  { %v908_v37 = vsel %vm872_vm2, %v1294_v35, 0.0 }
 0x3a7   :  { %v909_v38 = vadd.f32 %v908_v37, %v907_v36 }
 0x3a9   :  { %v910_v39 = vrot.slane %v909_v38, 4 }
 0x3ab   :  { %v911_v40 = vadd.f32 %v910_v39, %v909_v38 }
 0x3ad   :  { %v912_v41 = vrot.slane %v911_v40, 2 }
 0x3af   :  { %v913_v42 = vadd.f32 %v912_v41, %v911_v40 }
 0x3b1   :  { %v914_v43 = vrot.slane %v913_v42, 1 }
 0x3b3   :  { %v915_v45 = vadd.f32 %v914_v43, %v913_v42 }
 0x3b5   :  { %1295 = vlog2.f32 %v915_v45 }
 0x3bf   :  { %v1296_v51 = vpop.eup %1295 }
 0x3c0   :  { %v917_v56 = vmul.f32 0.6931472, %v1296_v51 }
 0x3c2   :  { %v918_v58 = vadd.f32 %v917_v56, %v900_v29 }
 0x3c4   :  { %v947_v59 = vsel %vm946_vm4, %v918_v58, 0.0 }
 0x413   :  { %v871_v44 = vpop.xlane.xlu0 %870 }
 0x414   :  { %v876_v46 = vsub.f32 %v866_v16, %v871_v44 }
 0x415   :  { %v875_v47 = vpop.xlane.xlu1 %874 }
 0x416   :  { %v878_v48 = vmul.f32 1.442695, %v876_v46  ;;  %v877_v49 = vsub.f32 %v867_v19, %v875_v47 }
 0x418   :  { %1297 = vpow2.f32 %v878_v48  ;;  %v880_v50 = vmul.f32 1.442695, %v877_v49 }
 0x41a   :  { %1299 = vpow2.f32 %v880_v50 }
 0x422   :  { %v1298_v52 = vpop.eup %1297 }
 0x423   :  { %v882_v53 = vsel %vm868_vm1, %v1298_v52, 0.0 }
 0x424   :  { %v1300_v54 = vpop.eup %1299  ;;  %883 = vadd.xlane.f32.xlu0 %v882_v53 }
 0x425   :  { %v885_v55 = vsel %vm872_vm2, %v1300_v54, 0.0 }
 0x426   :  { %886 = vadd.xlane.f32.xlu1 %v885_v55 }
 0x428   :  { %921 = vadd.xlane.f32.xlu0 %v919_v9 }
 0x42a   :  { %925 = vadd.xlane.f32.xlu1 %v924_v57 }
 0x42e   :  { %948 = vadd.xlane.f32.xlu1 %v947_v59 }
 0x4b1   :  { %v884_v60 = vpop.xlane.xlu0 %883 }
 0x4b2   :  { %1301 = vlog2.f32 %v884_v60 }
 0x4b3   :  { %v887_v61 = vpop.xlane.xlu1 %886 }
 0x4b4   :  { %1303 = vlog2.f32 %v887_v61 }
 0x4b5   :  { %v922_v5 = vpop.xlane.xlu0 %921 }
 0x4b6   :  { %v927_v8 = vmul.f32 14.285714, %v922_v5 }
 0x4b7   :  { %v926_v1 = vpop.xlane.xlu1 %925 }
 0x4b8   :  { %v928_v6 = vmul.f32 14.285714, %v926_v1  ;;  %v962_v12 = vsel %vm929_vm5, %v927_v8, 0.0 }
 0x4ba   :  { %v963_v11 = vsel %vm931_vm6, %v928_v6, 0.0 }
 0x4bb   :  { %v964_v13 = vadd.f32 %v963_v11, %v962_v12 }
 0x4bc   :  { %v1302_v62 = vpop.eup %1301 }
 0x4bd   :  { %v889_v63 = vmul.f32 0.6931472, %v1302_v62 }
 0x4be   :  { %v1304_v0 = vpop.eup %1303 }
 0x4bf   :  { %v891_v3 = vmul.f32 0.6931472, %v1304_v0  ;;  %v892_v4 = vadd.f32 %v889_v63, %v871_v44 }
 0x4c1   :  { %v893_v7 = vadd.f32 %v891_v3, %v875_v47  ;;  %v930_v2 = vsel %vm929_vm5, %v892_v4, 0.0 }
 0x4c3   :  { %v932_v9 = vsel %vm931_vm6, %v893_v7, 0.0 }
 0x4c4   :  { %v933_v10 = vadd.f32 %v932_v9, %v930_v2 }
 0x4c6   :  { %934 = vadd.xlane.f32.xlu0 %v933_v10 }
 0x4ca   :  { %965 = vadd.xlane.f32.xlu0 %v964_v13 }
 0x4cb   :  { %1316 = shalt.err (!%p1313_p4)
}
 0x4cc   :  { %s1317_s8 = scalar_lea.hbm %s1778_s5, 256 }
 0x4cd   :  { %p1318_p5 = scmp.ne.s32.totalorder %s1778_s5, %s1317_s8  ;;  %p1321_p6 = scmp.lt.u32.totalorder %s1317_s8, %s1778_s5 }
 0x4cf   :  { %p1323_p7 = pnand %p1321_p6, %p1318_p5 }
 0x4d1   :  { %1326 = shalt.err (!%p1323_p7)
}
 0x4d2   :  { %s1368_s12 = smov 128   ;;  %s1369_s13 = smov 8  }
 0x4d3   :  { %991 = dma.vmem_to_hbm [thread:$0]  %s986_s27, 256, %s1778_s5, [#allocation4], %s1368_s12, %s1368_s12, %s1369_s13  }
 0x4d4   :  { %s1370_s16 = smov [#allocation6]  }
 0x4d5   :  { %s997_s17 = sshll.u32 %s1370_s16, 4  ;;  %s998_s17 = int_to_ptr.vmem [resolvable:$true] %s997_s17 }
 0x4d6   :  { %s1327_s18 = scalar_lea.vmem %s998_s17, 256  ;;  %p1332_p9 = scmp.lt.s32.totalorder %s998_s17, %s998_s17 }
 0x4d7   :  { %p1328_p8 = scmp.ne.s32.totalorder %s998_s17, %s1327_s18  ;;  %p1333_p10 = scmp.lt.s32.totalorder %s1327_s18, %s1327_s18 }
 0x4d9   :  { %p1334_p11 = por %p1333_p10, %p1332_p9 }
 0x4db   :  { %p1335_p12 = pnand %p1334_p11, %p1328_p8 }
 0x4dd   :  { %1338 = shalt.err (!%p1335_p12)
}
 0x4de   :  { %s1339_s21 = scalar_lea.hbm %s1779_s6, 256 }
 0x4df   :  { %p1340_p13 = scmp.ne.s32.totalorder %s1779_s6, %s1339_s21  ;;  %p1343_p0 = scmp.lt.u32.totalorder %s1339_s21, %s1779_s6 }
 0x4e1   :  { %p1345_p1 = pnand %p1343_p0, %p1340_p13 }
 0x4e3   :  { %1348 = shalt.err (!%p1345_p1)
}
 0x4e4   :  { %1003 = dma.vmem_to_hbm [thread:$0]  %s998_s17, 256, %s1779_s6, [#allocation7], %s1368_s12, %s1368_s12, %s1369_s13   ;;  %v949_v14 = vpop.xlane.xlu1 %948 }
 0x4e5   :  { %v950_v15 = vrot.slane %v949_v14, 4  ;;  %s1349_s0 = scalar_lea.hbm %s1780_s7, 16 }
 0x4e6   :  { %p1350_p2 = scmp.ne.s32.totalorder %s1780_s7, %s1349_s0  ;;  %p1353_p3 = scmp.lt.u32.totalorder %s1349_s0, %s1780_s7 }
 0x4e7   :  { %v951_v16 = vadd.f32 %v950_v15, %v949_v14 }
 0x4e8   :  { %p1355_p4 = pnand %p1353_p3, %p1350_p2 }
 0x4e9   :  { %v952_v17 = vrot.slane %v951_v16, 2 }
 0x4eb   :  { %v953_v21 = vadd.f32 %v952_v17, %v951_v16 }
 0x4ed   :  { %v954_v27 = vrot.slane %v953_v21, 1 }
 0x4ef   :  { %v955_v32 = vadd.f32 %v954_v27, %v953_v21 }
 0x553   :  { %v935_v18 = vpop.xlane.xlu0 %934 }
 0x554   :  { %v936_v19 = vrot.slane %v935_v18, 4 }
 0x556   :  { %v937_v20 = vadd.f32 %v936_v19, %v935_v18 }
 0x557   :  { %v966_v22 = vpop.xlane.xlu0 %965 }
 0x558   :  { %v938_v23 = vrot.slane %v937_v20, 2  ;;  %v967_v24 = vrot.slane %v966_v22, 4 }
 0x55a   :  { %v968_v25 = vadd.f32 %v967_v24, %v966_v22  ;;  %v939_v26 = vadd.f32 %v938_v23, %v937_v20 }
 0x55c   :  { %v969_v28 = vrot.slane %v968_v25, 2  ;;  %v940_v29 = vrot.slane %v939_v26, 1 }
 0x55e   :  { %v970_v30 = vadd.f32 %v969_v28, %v968_v25  ;;  %v941_v31 = vadd.f32 %v940_v29, %v939_v26 }
 0x560   :  { %1158 = vpush %v941_v31  ;;  %v971_v33 = vrot.slane %v970_v30, 1 }
 0x561   :  { %1160 = vpush %v955_v32 }
 0x562   :  { %v972_v34 = vadd.f32 %v971_v33, %v970_v30 }
 0x564   :  { %1162 = vpush %v972_v34 }
 0x591   :  { %s1159_s6 = spop %1158 }
 0x592   :  { %s945_s1 = smul.f32 0.1, %s1159_s6  ;;  %s1161_s3 = spop %1160 }
 0x593   :  { %s959_s26 = smul.f32 0.1, %s1161_s3 }
 0x595   :  { %s960_s4 = sadd.f32 %s959_s26, %s945_s1  ;;  %s1163_s27 = spop %1162 }
 0x596   :  { %s976_s28 = smul.f32 0.1, %s1163_s27 }
 0x597   :  { %s961_s29 = smul.f32 0.5, %s960_s4 }
 0x599   :  { %s977_s30 = ssub.f32 %s961_s29, %s976_s28 }
 0x59b   :  { %979 = sst [smem:[#allocation8]] %s977_s30 }
 0x59c   :  { %1358 = shalt.err (!%p1355_p4)
}
 0x59d   :  { %s1371_s14 = smov [#allocation8]  }
 0x59e   :  { %1011 = dma.smem_to_hbm %s1371_s14, 16, %s1780_s7, [#allocation5]  }
 0x59f   :  { %1359 = dma.done.wait [#allocation4], 256  }
 0x5a0   :  { %1360 = vsyncadd [#allocation4], 4294967040 }
 0x5a1   :  { %1361 = dma.done.wait [#allocation7], 256  }
 0x5a2   :  { %1362 = vsyncadd [#allocation7], 4294967040 }
 0x5a3   :  { %1363 = dma.done.wait [#allocation5], 16  }
 0x5a4   :  { %1364 = vsyncadd [#allocation5], 4294967280 }
 0x5a5   :  { %1021 = sfence }
 0x5a6   :  { %1022 = vsyncpa [#allocation4], 1 }
 0x5a7   :  { %1023 = vsyncpa [#allocation7], 1 }
 0x5a8   :  { %1024 = vsyncpa [#allocation5], 1 }

</bundles_post_ra>
